<compile_context>
chip_gen: v7x
topology: tpu7x:2x2x1
jax: 0.10.0
libtpu: 0.0.40
codegen_flags: <defaults>
</compile_context>

<pallas_src>
import jax
import jax.numpy as jnp
from jax.experimental import pallas as pl
from jax.experimental.pallas import tpu as pltpu

IN_DIM = 3
IN_PAD = 8          # K dim padded to one f32 sublane tile
H1_DIM = 256
H2_DIM = 128
OUT_DIM = 1

MAX_TILE_B = 8192   # transposed layout ~2 KiB live VMEM per batch row


def _round_up(x, m):
    return ((x + m - 1) // m) * m


def _mlp_kernel(x_ref, w1t_ref, b1_ref, w2t_ref, b2_ref, w3_ref, b3_ref, o_ref):
    x = x_ref[...]                                   # (8, TB) f32, rows 3..7 zero

    # ---- Layer 1: (256, 8) @ (8, TB) on the MXU, f32 (exact-ish) ----
    h1 = jnp.dot(w1t_ref[...], x,
                 preferred_element_type=jnp.float32)             # (256, TB)
    h1 = jnp.maximum(h1 + b1_ref[...], 0.0)   # bias+ReLU; Dropout(0.3)=identity

    # ---- Layer 2: (128, 256) bf16 @ (256, TB) bf16 -> f32 on the MXU ----
    h2 = jnp.dot(w2t_ref[...], h1.astype(jnp.bfloat16),
                 preferred_element_type=jnp.float32)             # (128, TB)
    h2 = jnp.maximum(h2 + b2_ref[...], 0.0)   # f32 epilogue; Dropout = identity

    # ---- Layer 3: (1, 128) @ (128, TB) on the MXU -> lane-dense (1, TB) ----
    logits = jnp.dot(w3_ref[...], h2,
                     preferred_element_type=jnp.float32) + b3_ref[...]

    # ---- Sigmoid: exp on EUP, approximate reciprocal on EUP ----
    o_ref[...] = pl.reciprocal(1.0 + jnp.exp(-logits), approx=True)   # (1, TB)


def prepare_params(params):
    """One-time prep: transpose / pad / cast weights into kernel layout."""
    w1, b1, w2, b2, w3, b3 = params
    w1t = jnp.pad(w1.astype(jnp.float32),
                  ((0, IN_PAD - IN_DIM), (0, 0))).T            # (256, 8)  f32
    return (
        w1t,
        b1.reshape(H1_DIM, 1).astype(jnp.float32),             # (256, 1)  f32
        w2.astype(jnp.bfloat16).T,                              # (128, 256) bf16
        b2.reshape(H2_DIM, 1).astype(jnp.float32),              # (128, 1)  f32
        w3.reshape(H2_DIM, OUT_DIM).astype(jnp.float32).T,      # (1, 128)  f32
        b3.reshape(1, 1).astype(jnp.float32),                   # (1, 1)    f32
    )


def _choose_tile_b(B):
    if B <= 256:
        return B                                   # single tile; full-dim block
    # >= 2 grid steps (v7x megacore) and MXU-friendly multiples of 256.
    return min(MAX_TILE_B, _round_up(pl.cdiv(B, 2), 256))


def discriminator_forward(x, prepped):
    """x: (B, 3) float32 -> (B, 1) float32."""
    w1t, b1, w2t, b2, w3, b3 = prepped
    B = x.shape[0]

    # Batch-on-lanes input slab: (8, B) with rows 3..7 zero-padded.
    x_t = jnp.pad(x.T.astype(jnp.float32), ((0, IN_PAD - IN_DIM), (0, 0)))

    tile_b = _choose_tile_b(B)
    grid = (pl.cdiv(B, tile_b),)

    const = lambda i: (0, 0)  # weights/biases: same block every step (VMEM-resident)

    out = pl.pallas_call(
        _mlp_kernel,
        out_shape=jax.ShapeDtypeStruct((OUT_DIM, B), jnp.float32),
        grid=grid,
        in_specs=[
            pl.BlockSpec((IN_PAD, tile_b), lambda i: (0, i)),   # x slab tile
            pl.BlockSpec((H1_DIM, IN_PAD), const),              # w1^T (padded K)
            pl.BlockSpec((H1_DIM, 1), const),                   # b1
            pl.BlockSpec((H2_DIM, H1_DIM), const),              # w2^T (bf16)
            pl.BlockSpec((H2_DIM, 1), const),                   # b2
            pl.BlockSpec((1, H2_DIM), const),                   # w3 row
            pl.BlockSpec((1, 1), const),                        # b3
        ],
        out_specs=pl.BlockSpec((OUT_DIM, tile_b), lambda i: (0, i)),  # lane-dense
        compiler_params=pltpu.CompilerParams(
            dimension_semantics=("parallel",),
            vmem_limit_bytes=48 * 1024 * 1024,
        ),
    )(x_t, w1t, b1, w2t, b2, w3, b3)

    return out.reshape(B, OUT_DIM)


def init_params(key):
    """Deterministic init mimicking PyTorch's default Linear init
    (uniform(-1/sqrt(fan_in), 1/sqrt(fan_in)))."""
    ks = jax.random.split(key, 6)

    def lin(kw, kb, fan_in, fan_out):
        bound = 1.0 / jnp.sqrt(fan_in)
        w = jax.random.uniform(kw, (fan_in, fan_out), jnp.float32, -bound, bound)
        b = jax.random.uniform(kb, (fan_out,), jnp.float32, -bound, bound)
        return w, b

    w1, b1 = lin(ks[0], ks[1], IN_DIM, H1_DIM)
    w2, b2 = lin(ks[2], ks[3], H1_DIM, H2_DIM)
    w3, b3 = lin(ks[4], ks[5], H2_DIM, OUT_DIM)
    return (w1, b1, w2, b2, w3, b3)


def reference_forward(x, params):
    w1, b1, w2, b2, w3, b3 = params
    h1 = jnp.maximum(x @ w1 + b1, 0.0)
    h2 = jnp.maximum(h1 @ w2 + b2, 0.0)
    return jax.nn.sigmoid(h2 @ w3 + b3)


if __name__ == "__main__":
    key = jax.random.PRNGKey(0)
    pkey, xkey = jax.random.split(key)

    params = init_params(pkey)
    prepped = prepare_params(params)
    x = jax.random.normal(xkey, (8, IN_DIM), jnp.float32)  # batch=8, in_features=3

    out = discriminator_forward(x, prepped)
    out = jax.block_until_ready(out)

    ref = reference_forward(x, params)
    assert out.shape == (8, OUT_DIM)
    # bf16 layer-2 matmul + approx EUP reciprocal -> relaxed tolerance vs f32 ref.
    assert jnp.allclose(out, ref, atol=1e-2, rtol=1e-2), (out, ref)

    print("KERNEL_OK")
</pallas_src>

<mosaic_0001>
module attributes {stable_mosaic.version = 11 : i64} {
  func.func @_mlp_kernel(%arg0: i32, %arg1: memref<8x8xf32, #tpu.memory_space<vmem>>, %arg2: memref<256x8xf32, #tpu.memory_space<vmem>>, %arg3: memref<256x1xf32, #tpu.memory_space<vmem>>, %arg4: memref<128x256xbf16, #tpu.memory_space<vmem>>, %arg5: memref<128x1xf32, #tpu.memory_space<vmem>>, %arg6: memref<1x128xf32, #tpu.memory_space<vmem>>, %arg7: memref<1x1xf32, #tpu.memory_space<vmem>>, %arg8: memref<1x8xf32, #tpu.memory_space<vmem>>) attributes {dimension_semantics = [#tpu.dimension_semantics<parallel>], iteration_bounds = array<i64: 1>, scalar_prefetch = 0 : i64, scratch_operands = 0 : i64, tpu.core_type = #tpu.core_type<tc>, window_params = [{transform_indices = @transform_0, window_bounds = array<i64: 8, 8>}, {pipeline_mode = #tpu.pipeline_mode<synchronous>, transform_indices = @transform_1, window_bounds = array<i64: 256, 8>}, {pipeline_mode = #tpu.pipeline_mode<synchronous>, transform_indices = @transform_2, window_bounds = array<i64: 256, 1>}, {pipeline_mode = #tpu.pipeline_mode<synchronous>, transform_indices = @transform_3, window_bounds = array<i64: 128, 256>}, {pipeline_mode = #tpu.pipeline_mode<synchronous>, transform_indices = @transform_4, window_bounds = array<i64: 128, 1>}, {pipeline_mode = #tpu.pipeline_mode<synchronous>, transform_indices = @transform_5, window_bounds = array<i64: 1, 128>}, {pipeline_mode = #tpu.pipeline_mode<synchronous>, transform_indices = @transform_6, window_bounds = array<i64: 1, 1>}, {transform_indices = @transform_7, window_bounds = array<i64: 1, 8>}]} {
    %c0 = arith.constant 0 : index
    %c0_0 = arith.constant 0 : index
    %0 = vector.load %arg1[%c0, %c0_0] : memref<8x8xf32, #tpu.memory_space<vmem>>, vector<8x8xf32>
    %c0_1 = arith.constant 0 : index
    %c0_2 = arith.constant 0 : index
    %1 = vector.load %arg2[%c0_1, %c0_2] : memref<256x8xf32, #tpu.memory_space<vmem>>, vector<256x8xf32>
    %cst = arith.constant dense<0.000000e+00> : vector<256x8xf32>
    %2 = tpu.matmul %1, %0, %cst {dimension_numbers = #tpu.dot_dimension_numbers<[1], [0], [0], [1], [0, 0, 1, 1], [], []>} : vector<256x8xf32>, vector<8x8xf32>, vector<256x8xf32> -> vector<256x8xf32>
    %c0_3 = arith.constant 0 : index
    %c0_4 = arith.constant 0 : index
    %3 = vector.load %arg3[%c0_3, %c0_4] : memref<256x1xf32, #tpu.memory_space<vmem>>, vector<256x1xf32>
    %4 = vector.broadcast %3 : vector<256x1xf32> to vector<256x8xf32>
    %5 = arith.addf %2, %4 : vector<256x8xf32>
    %cst_5 = arith.constant 0.000000e+00 : f32
    %6 = vector.broadcast %cst_5 : f32 to vector<256x8xf32>
    %7 = arith.maximumf %5, %6 : vector<256x8xf32>
    %c0_6 = arith.constant 0 : index
    %c0_7 = arith.constant 0 : index
    %8 = vector.load %arg4[%c0_6, %c0_7] : memref<128x256xbf16, #tpu.memory_space<vmem>>, vector<128x256xbf16>
    %9 = arith.truncf %7 : vector<256x8xf32> to vector<256x8xbf16>
    %cst_8 = arith.constant dense<0.000000e+00> : vector<128x8xf32>
    %10 = tpu.matmul %8, %9, %cst_8 {dimension_numbers = #tpu.dot_dimension_numbers<[1], [0], [0], [1], [0, 0, 1, 1], [], []>} : vector<128x256xbf16>, vector<256x8xbf16>, vector<128x8xf32> -> vector<128x8xf32>
    %c0_9 = arith.constant 0 : index
    %c0_10 = arith.constant 0 : index
    %11 = vector.load %arg5[%c0_9, %c0_10] : memref<128x1xf32, #tpu.memory_space<vmem>>, vector<128x1xf32>
    %12 = vector.broadcast %11 : vector<128x1xf32> to vector<128x8xf32>
    %13 = arith.addf %10, %12 : vector<128x8xf32>
    %cst_11 = arith.constant 0.000000e+00 : f32
    %14 = vector.broadcast %cst_11 : f32 to vector<128x8xf32>
    %15 = arith.maximumf %13, %14 : vector<128x8xf32>
    %c0_12 = arith.constant 0 : index
    %c0_13 = arith.constant 0 : index
    %16 = vector.load %arg6[%c0_12, %c0_13] : memref<1x128xf32, #tpu.memory_space<vmem>>, vector<1x128xf32>
    %cst_14 = arith.constant dense<0.000000e+00> : vector<1x8xf32>
    %17 = tpu.matmul %16, %15, %cst_14 {dimension_numbers = #tpu.dot_dimension_numbers<[1], [0], [0], [1], [0, 0, 1, 1], [], []>} : vector<1x128xf32>, vector<128x8xf32>, vector<1x8xf32> -> vector<1x8xf32>
    %c0_15 = arith.constant 0 : index
    %c0_16 = arith.constant 0 : index
    %18 = vector.load %arg7[%c0_15, %c0_16] : memref<1x1xf32, #tpu.memory_space<vmem>>, vector<1x1xf32>
    %19 = vector.broadcast %18 : vector<1x1xf32> to vector<1x8xf32>
    %20 = arith.addf %17, %19 : vector<1x8xf32>
    %cst_17 = arith.constant 0.000000e+00 : f32
    %21 = vector.broadcast %cst_17 : f32 to vector<1x8xf32>
    %22 = arith.subf %21, %20 : vector<1x8xf32>
    %23 = math.exp %22 : vector<1x8xf32>
    %cst_18 = arith.constant 1.000000e+00 : f32
    %24 = vector.broadcast %cst_18 : f32 to vector<1x8xf32>
    %25 = arith.addf %24, %23 : vector<1x8xf32>
    %26 = tpu.reciprocal %25 {approx = true} : vector<1x8xf32> -> vector<1x8xf32>
    %c0_19 = arith.constant 0 : index
    %c0_20 = arith.constant 0 : index
    %27 = vector.load %arg8[%c0_19, %c0_20] : memref<1x8xf32, #tpu.memory_space<vmem>>, vector<1x8xf32>
    tpu.vector_store %arg8[%c0_19, %c0_20], %26 {strides = array<i32>} : memref<1x8xf32, #tpu.memory_space<vmem>>, vector<1x8xf32>,
    return
  }
  func.func @transform_0(%arg0: i32) -> (i32, i32) {
    %c0_i32 = arith.constant 0 : i32
    %c0_i32_0 = arith.constant 0 : i32
    return %c0_i32, %arg0 : i32, i32
  }
  func.func @transform_1(%arg0: i32) -> (i32, i32) {
    %c0_i32 = arith.constant 0 : i32
    %c0_i32_0 = arith.constant 0 : i32
    %c0_i32_1 = arith.constant 0 : i32
    return %c0_i32, %c0_i32_0 : i32, i32
  }
  func.func @transform_2(%arg0: i32) -> (i32, i32) {
    %c0_i32 = arith.constant 0 : i32
    %c0_i32_0 = arith.constant 0 : i32
    %c0_i32_1 = arith.constant 0 : i32
    return %c0_i32, %c0_i32_0 : i32, i32
  }
  func.func @transform_3(%arg0: i32) -> (i32, i32) {
    %c0_i32 = arith.constant 0 : i32
    %c0_i32_0 = arith.constant 0 : i32
    %c0_i32_1 = arith.constant 0 : i32
    return %c0_i32, %c0_i32_0 : i32, i32
  }
  func.func @transform_4(%arg0: i32) -> (i32, i32) {
    %c0_i32 = arith.constant 0 : i32
    %c0_i32_0 = arith.constant 0 : i32
    %c0_i32_1 = arith.constant 0 : i32
    return %c0_i32, %c0_i32_0 : i32, i32
  }
  func.func @transform_5(%arg0: i32) -> (i32, i32) {
    %c0_i32 = arith.constant 0 : i32
    %c0_i32_0 = arith.constant 0 : i32
    %c0_i32_1 = arith.constant 0 : i32
    return %c0_i32, %c0_i32_0 : i32, i32
  }
  func.func @transform_6(%arg0: i32) -> (i32, i32) {
    %c0_i32 = arith.constant 0 : i32
    %c0_i32_0 = arith.constant 0 : i32
    %c0_i32_1 = arith.constant 0 : i32
    return %c0_i32, %c0_i32_0 : i32, i32
  }
  func.func @transform_7(%arg0: i32) -> (i32, i32) {
    %c0_i32 = arith.constant 0 : i32
    %c0_i32_0 = arith.constant 0 : i32
    return %c0_i32, %arg0 : i32, i32
  }
}

</mosaic_0001>

<bundles_post_ra>
// kernel: tpu_custom_call.1
= control target key start
LH: loop header
LB: loop body
LE: loop exit
PB: predicated region body
PF: predicated region fallthrough
CT: control target
= control target key end

     0   :  { %s1828_s0 = inlined_call_operand.vmem [shape: f32[8,8], index: 0, kind: input, shape index: {}]   ;;  %s1829_s1 = inlined_call_operand.vmem [shape: f32[256,8], index: 1, kind: input, shape index: {}]   ;;  %s1830_s2 = inlined_call_operand.vmem [shape: f32[256,1], index: 2, kind: input, shape index: {}]   ;;  %s1831_s3 = inlined_call_operand.vmem [shape: bf16[128,256], index: 3, kind: input, shape index: {}]   ;;  %s1832_s4 = inlined_call_operand.vmem [shape: f32[128,1], index: 4, kind: input, shape index: {}]   ;;  %s1833_s5 = inlined_call_operand.vmem [shape: f32[1,128], index: 5, kind: input, shape index: {}]   ;;  %s1834_s6 = inlined_call_operand.<no memory space> [shape: f32[1,1], index: 6, kind: input, shape index: {}]   ;;  %s1835_s7 = inlined_call_operand.hbm [shape: f32[1,8], index: 7, kind: output, shape index: {}]  }
   0x1   :  { %v12_v0 = vstv %s1834_s6 }
   0x2   :  { %13 = vst [vmem:[#allocation2] sm:$0x1] %v12_v0 }
   0x3   :  { %v30_v1 = vld [vmem:[%s1828_s0] sm:$0xff]  ;;  %v1362_v4 = vmov 0   ;;  %vm255_vm0 = vcmask 64512   ;;  %v32_v6 = vld [vmem:[%s1829_s1 + $0x8] sm:$0xff]  ;;  %v33_v8 = vld [vmem:[%s1829_s1 + $0x10] sm:$0xff] }
   0x4   :  { %v79_v2 = vld [vmem:[%s1830_s2 + $0x80] sm:$0xff]  ;;  %1309 = vset.pattern.permute.xlu1 %v1362_v4  ;;  %1308 = vset.pattern.permute.xlu0 %v1362_v4  ;;  %v80_v7 = vld [vmem:[%s1830_s2 + $0x88] sm:$0xff]  ;;  %v34_v10 = vld [vmem:[%s1829_s1 + $0x18] sm:$0xff] }
   0x5   :  { %v63_v3 = vld [vmem:[%s1830_s2] sm:$0xff]  ;;  %1194 = vmatprep.subr.mxu0 %v30_v1  ;;  %177 = vperm.xlu0 %1308, %v79_v2   ;;  %v64_v9 = vld [vmem:[%s1830_s2 + $0x8] sm:$0xff]  ;;  %v81_v11 = vld [vmem:[%s1830_s2 + $0x90] sm:$0xff] }
   0x6   :  { %v31_v5 = vld [vmem:[%s1829_s1] sm:$0xff]  ;;  %97 = vperm.xlu1 %1309, %v63_v3   ;;  %1195 = vmatpush3.msra.mxu0 %v30_v1  ;;  %v82_v13 = vld [vmem:[%s1830_s2 + $0x98] sm:$0xff]  ;;  %v36_v14 = vld [vmem:[%s1829_s1 + $0x28] sm:$0xff] }
   0x7   :  { %1196 = vmatprep.mubr.msk.f32.mxu0 %vm255_vm0, %v31_v5  ;;  %v35_v12 = vld [vmem:[%s1829_s1 + $0x20] sm:$0xff]  ;;  %v65_v15 = vld [vmem:[%s1830_s2 + $0x10] sm:$0xff]  ;;  %v66_v17 = vld [vmem:[%s1830_s2 + $0x18] sm:$0xff] }
   0x8   :  { %1197 = vmatmul.mubr.msk.f32.vlgmr.msra.gmra.mrb[0].mxu0 %vm255_vm0, %v32_v6  ;;  %v37_v16 = vld [vmem:[%s1829_s1 + $0x30] sm:$0xff]  ;;  %v38_v18 = vld [vmem:[%s1829_s1 + $0x38] sm:$0xff]  ;;  %v83_v19 = vld [vmem:[%s1830_s2 + $0xa0] sm:$0xff] }
   0x9   :  { %182 = vperm.xlu0 %1308, %v80_v7   ;;  %1199 = vmatprep.mubr.msk.f32.mxu0 %vm255_vm0, %v33_v8  ;;  %v39_v20 = vld [vmem:[%s1829_s1 + $0x40] sm:$0xff]  ;;  %v84_v21 = vld [vmem:[%s1830_s2 + $0xa8] sm:$0xff]  ;;  %v41_v24 = vld [vmem:[%s1829_s1 + $0x50] sm:$0xff] }
   0xa   :  { %102 = vperm.xlu1 %1309, %v64_v9   ;;  %v40_v22 = vld [vmem:[%s1829_s1 + $0x48] sm:$0xff]  ;;  %v67_v23 = vld [vmem:[%s1830_s2 + $0x20] sm:$0xff]  ;;  %v42_v26 = vld [vmem:[%s1829_s1 + $0x58] sm:$0xff] }
   0xb   :  { %v68_v25 = vld [vmem:[%s1830_s2 + $0x28] sm:$0xff]  ;;  %v85_v27 = vld [vmem:[%s1830_s2 + $0xb0] sm:$0xff]  ;;  %v43_v28 = vld [vmem:[%s1829_s1 + $0x60] sm:$0xff] }
   0xc   :  { %1200 = vmatmul.mubr.msk.f32.gmra.mrb[2].mxu0 %vm255_vm0, %v34_v10  ;;  %v86_v29 = vld [vmem:[%s1830_s2 + $0xb8] sm:$0xff]  ;;  %v44_v30 = vld [vmem:[%s1829_s1 + $0x68] sm:$0xff]  ;;  %v69_v31 = vld [vmem:[%s1830_s2 + $0x30] sm:$0xff] }
   0xd   :  { %187 = vperm.xlu0 %1308, %v81_v11   ;;  %1202 = vmatprep.mubr.msk.f32.mxu0 %vm255_vm0, %v35_v12  ;;  %v70_v32 = vld [vmem:[%s1830_s2 + $0x38] sm:$0xff]  ;;  %v45_v33 = vld [vmem:[%s1829_s1 + $0x70] sm:$0xff]  ;;  %v87_v35 = vld [vmem:[%s1830_s2 + $0xc0] sm:$0xff] }
   0xe   :  { %192 = vperm.xlu1 %1309, %v82_v13   ;;  %v46_v34 = vld [vmem:[%s1829_s1 + $0x78] sm:$0xff]  ;;  %v47_v36 = vld [vmem:[%s1829_s1 + $0x80] sm:$0xff]  ;;  %v88_v37 = vld [vmem:[%s1830_s2 + $0xc8] sm:$0xff] }
  0x10   :  { %1203 = vmatmul.mubr.msk.f32.gmra.mrb[4].mxu0 %vm255_vm0, %v36_v14 }
  0x11   :  { %107 = vperm.xlu0 %1308, %v65_v15   ;;  %1205 = vmatprep.mubr.msk.f32.mxu0 %vm255_vm0, %v37_v16 }
  0x12   :  { %112 = vperm.xlu1 %1309, %v66_v17  }
  0x14   :  { %1206 = vmatmul.mubr.msk.f32.gmra.mrb[6].mxu0 %vm255_vm0, %v38_v18 }
  0x15   :  { %197 = vperm.xlu0 %1308, %v83_v19   ;;  %1208 = vmatprep.mubr.msk.f32.mxu0 %vm255_vm0, %v39_v20 }
  0x16   :  { %202 = vperm.xlu1 %1309, %v84_v21  }
  0x18   :  { %1209 = vmatmul.mubr.msk.f32.gmra.mrb[8].mxu0 %vm255_vm0, %v40_v22 }
  0x19   :  { %117 = vperm.xlu0 %1308, %v67_v23   ;;  %1211 = vmatprep.mubr.msk.f32.mxu0 %vm255_vm0, %v41_v24 }
  0x1a   :  { %122 = vperm.xlu1 %1309, %v68_v25  }
  0x1c   :  { %1212 = vmatmul.mubr.msk.f32.gmra.mrb[10].mxu0 %vm255_vm0, %v42_v26 }
  0x1d   :  { %207 = vperm.xlu0 %1308, %v85_v27   ;;  %1214 = vmatprep.mubr.msk.f32.mxu0 %vm255_vm0, %v43_v28 }
  0x1e   :  { %212 = vperm.xlu1 %1309, %v86_v29  }
  0x20   :  { %1215 = vmatmul.mubr.msk.f32.gmra.mrb[12].mxu0 %vm255_vm0, %v44_v30 }
  0x21   :  { %127 = vperm.xlu0 %1308, %v69_v31   ;;  %1217 = vmatprep.mubr.msk.f32.mxu0 %vm255_vm0, %v45_v33 }
  0x22   :  { %132 = vperm.xlu1 %1309, %v70_v32  }
  0x23   :  { %14 = vsyncpa [#allocation4], 0  ;;  %v48_v38 = vld [vmem:[%s1829_s1 + $0x88] sm:$0xff]  ;;  %v71_v39 = vld [vmem:[%s1830_s2 + $0x40] sm:$0xff]  ;;  %vm1364_vm1 = vmmov 0   ;;  %s1366_s13 = smov [#allocation3]  }
  0x24   :  { %1218 = vmatmul.mubr.msk.f32.gmra.mrb[14].mxu0 %vm255_vm0, %v46_v34  ;;  %v49_v40 = vld [vmem:[%s1829_s1 + $0x90] sm:$0xff]  ;;  %v72_v41 = vld [vmem:[%s1830_s2 + $0x48] sm:$0xff]  ;;  %v50_v42 = vld [vmem:[%s1829_s1 + $0x98] sm:$0xff]  ;;  %s1024_s14 = sshll.u32 %s1366_s13, 4  ;;  %vm1016_vm2 = vcmask 57344   ;;  %s1025_s14 = int_to_ptr.vmem [resolvable:$true] %s1024_s14 }
  0x25   :  { %217 = vperm.xlu0 %1308, %v87_v35   ;;  %1220 = vmatprep.mubr.msk.f32.mxu0 %vm255_vm0, %v47_v36  ;;  %v89_v43 = vld [vmem:[%s1830_s2 + $0xd0] sm:$0xff]  ;;  %v51_v44 = vld [vmem:[%s1829_s1 + $0xa0] sm:$0xff]  ;;  %v90_v45 = vld [vmem:[%s1830_s2 + $0xd8] sm:$0xff]  ;;  %s1342_s15 = scalar_lea.vmem %s1025_s14, 32  ;;  %p1343_p1 = scmp.lt.s32.totalorder %s1025_s14, %s1025_s14 }
  0x26   :  { %222 = vperm.xlu1 %1309, %v88_v37   ;;  %v52_v46 = vld [vmem:[%s1829_s1 + $0xa8] sm:$0xff]  ;;  %v73_v47 = vld [vmem:[%s1830_s2 + $0x50] sm:$0xff]  ;;  %v74_v49 = vld [vmem:[%s1830_s2 + $0x58] sm:$0xff] }
  0x27   :  { %v53_v48 = vld [vmem:[%s1829_s1 + $0xb0] sm:$0xff]  ;;  %v54_v50 = vld [vmem:[%s1829_s1 + $0xb8] sm:$0xff]  ;;  %v91_v51 = vld [vmem:[%s1830_s2 + $0xe0] sm:$0xff] }
  0x28   :  { %1221 = vmatmul.mubr.msk.f32.gmra.mrb[16].mxu0 %vm255_vm0, %v48_v38  ;;  %v55_v52 = vld [vmem:[%s1829_s1 + $0xc0] sm:$0xff]  ;;  %v92_v53 = vld [vmem:[%s1830_s2 + $0xe8] sm:$0xff]  ;;  %v57_v56 = vld [vmem:[%s1829_s1 + $0xd0] sm:$0xff] }
  0x29   :  { %137 = vperm.xlu0 %1308, %v71_v39   ;;  %1223 = vmatprep.mubr.msk.f32.mxu0 %vm255_vm0, %v49_v40  ;;  %v56_v54 = vld [vmem:[%s1829_s1 + $0xc8] sm:$0xff]  ;;  %v75_v55 = vld [vmem:[%s1830_s2 + $0x60] sm:$0xff]  ;;  %v58_v58 = vld [vmem:[%s1829_s1 + $0xd8] sm:$0xff] }
  0x2a   :  { %142 = vperm.xlu1 %1309, %v72_v41   ;;  %v76_v57 = vld [vmem:[%s1830_s2 + $0x68] sm:$0xff]  ;;  %v93_v59 = vld [vmem:[%s1830_s2 + $0xf0] sm:$0xff]  ;;  %v59_v60 = vld [vmem:[%s1829_s1 + $0xe0] sm:$0xff] }
  0x2b   :  { %v94_v61 = vld [vmem:[%s1830_s2 + $0xf8] sm:$0xff]  ;;  %v60_v62 = vld [vmem:[%s1829_s1 + $0xe8] sm:$0xff]  ;;  %v77_v63 = vld [vmem:[%s1830_s2 + $0x70] sm:$0xff] }
  0x2c   :  { %1224 = vmatmul.mubr.msk.f32.gmra.mrb[18].mxu0 %vm255_vm0, %v50_v42  ;;  %v61_v0 = vld [vmem:[%s1829_s1 + $0xf0] sm:$0xff]  ;;  %v78_v1 = vld [vmem:[%s1830_s2 + $0x78] sm:$0xff]  ;;  %v641_v3 = vld [vmem:[%s1832_s4] sm:$0xff] }
  0x2d   :  { %227 = vperm.xlu0 %1308, %v89_v43   ;;  %1226 = vmatprep.mubr.msk.f32.mxu0 %vm255_vm0, %v51_v44  ;;  %v62_v2 = vld [vmem:[%s1829_s1 + $0xf8] sm:$0xff]  ;;  %v642_v4 = vld [vmem:[%s1832_s4 + $0x8] sm:$0xff]  ;;  %v643_v5 = vld [vmem:[%s1832_s4 + $0x10] sm:$0xff] }
  0x2e   :  { %232 = vperm.xlu1 %1309, %v90_v45   ;;  %v644_v6 = vld [vmem:[%s1832_s4 + $0x18] sm:$0xff]  ;;  %v645_v7 = vld [vmem:[%s1832_s4 + $0x20] sm:$0xff]  ;;  %v646_v8 = vld [vmem:[%s1832_s4 + $0x28] sm:$0xff] }
  0x2f   :  { %v647_v9 = vld [vmem:[%s1832_s4 + $0x30] sm:$0xff]  ;;  %v648_v10 = vld [vmem:[%s1832_s4 + $0x38] sm:$0xff]  ;;  %v649_v11 = vld [vmem:[%s1832_s4 + $0x40] sm:$0xff] }
  0x30   :  { %1227 = vmatmul.mubr.msk.f32.gmra.mrb[20].mxu0 %vm255_vm0, %v52_v46  ;;  %v650_v12 = vld [vmem:[%s1832_s4 + $0x48] sm:$0xff]  ;;  %v651_v13 = vld [vmem:[%s1832_s4 + $0x50] sm:$0xff]  ;;  %v652_v14 = vld [vmem:[%s1832_s4 + $0x58] sm:$0xff] }
  0x31   :  { %147 = vperm.xlu0 %1308, %v73_v47   ;;  %1229 = vmatprep.mubr.msk.f32.mxu0 %vm255_vm0, %v53_v48  ;;  %v653_v15 = vld [vmem:[%s1832_s4 + $0x60] sm:$0xff]  ;;  %v654_v16 = vld [vmem:[%s1832_s4 + $0x68] sm:$0xff]  ;;  %v655_v17 = vld [vmem:[%s1832_s4 + $0x70] sm:$0xff] }
  0x32   :  { %152 = vperm.xlu1 %1309, %v74_v49   ;;  %v656_v18 = vld [vmem:[%s1832_s4 + $0x78] sm:$0xff]  ;;  %v931_v19 = vld [vmem:[#allocation2] sm:$0x1]  ;;  %v1312_v22 = vld [vmem:[%s1831_s3 + $0x4] ss:$8 sps:$4 sm:$0xff]  }
  0x33   :  { %849 = vmatprep.mubr.bf16.mxu1 %v1312_v22 }
  0x34   :  { %1230 = vmatmul.mubr.msk.f32.gmra.mrb[22].mxu0 %vm255_vm0, %v54_v50 }
  0x35   :  { %237 = vperm.xlu0 %1308, %v91_v51   ;;  %1232 = vmatprep.mubr.msk.f32.mxu0 %vm255_vm0, %v55_v52 }
  0x36   :  { %242 = vperm.xlu1 %1309, %v92_v53  }
  0x38   :  { %1233 = vmatmul.mubr.msk.f32.gmra.mrb[24].mxu0 %vm255_vm0, %v56_v54 }
  0x39   :  { %157 = vperm.xlu0 %1308, %v75_v55   ;;  %1235 = vmatprep.mubr.msk.f32.mxu0 %vm255_vm0, %v57_v56 }
  0x3a   :  { %162 = vperm.xlu1 %1309, %v76_v57  }
  0x3c   :  { %1236 = vmatmul.mubr.msk.f32.gmra.mrb[26].mxu0 %vm255_vm0, %v58_v58 }
  0x3d   :  { %247 = vperm.xlu0 %1308, %v93_v59   ;;  %1238 = vmatprep.mubr.msk.f32.mxu0 %vm255_vm0, %v59_v60 }
  0x3e   :  { %252 = vperm.xlu1 %1309, %v94_v61  }
  0x40   :  { %1239 = vmatmul.mubr.msk.f32.gmra.mrb[28].mxu0 %vm255_vm0, %v60_v62 }
  0x41   :  { %167 = vperm.xlu0 %1308, %v77_v63   ;;  %1241 = vmatprep.mubr.msk.f32.mxu0 %vm255_vm0, %v61_v0 }
  0x42   :  { %172 = vperm.xlu1 %1309, %v78_v1  }
  0x44   :  { %1242 = vmatmul.mubr.msk.f32.gmra.mrb[30].mxu0 %vm255_vm0, %v62_v2 }
  0x45   :  { %659 = vperm.xlu0 %1308, %v641_v3  }
  0x46   :  { %664 = vperm.xlu1 %1309, %v642_v4  }
  0x49   :  { %669 = vperm.xlu0 %1308, %v643_v5  }
  0x4a   :  { %674 = vperm.xlu1 %1309, %v644_v6  }
  0x4d   :  { %679 = vperm.xlu0 %1308, %v645_v7  }
  0x4e   :  { %684 = vperm.xlu1 %1309, %v646_v8  }
  0x51   :  { %689 = vperm.xlu0 %1308, %v647_v9  }
  0x52   :  { %694 = vperm.xlu1 %1309, %v648_v10  }
  0x55   :  { %699 = vperm.xlu0 %1308, %v649_v11  }
  0x56   :  { %704 = vperm.xlu1 %1309, %v650_v12  }
  0x59   :  { %709 = vperm.xlu0 %1308, %v651_v13  }
  0x5a   :  { %714 = vperm.xlu1 %1309, %v652_v14  }
  0x5d   :  { %719 = vperm.xlu0 %1308, %v653_v15  }
  0x5e   :  { %724 = vperm.xlu1 %1309, %v654_v16  }
  0x61   :  { %729 = vperm.xlu0 %1308, %v655_v17  }
  0x62   :  { %734 = vperm.xlu1 %1309, %v656_v18  }
  0x65   :  { %934 = vperm.xlu0 %1308, %v931_v19  }
  0x84   :  { %v1685_v21 = vpop.permute.xlu0 %177 }
  0x85   :  { %v98_v20 = vpop.permute.xlu1 %97 }
  0x88   :  { %v1690_v24 = vpop.permute.xlu0 %182 }
  0x89   :  { %v103_v23 = vpop.permute.xlu1 %102 }
  0x8c   :  { %v1694_v26 = vpop.permute.xlu0 %187 }
  0x8d   :  { %v1692_v25 = vpop.permute.xlu1 %192 }
  0x90   :  { %v108_v28 = vpop.permute.xlu0 %107 }
  0x91   :  { %v113_v27 = vpop.permute.xlu1 %112 }
  0x94   :  { %v1698_v30 = vpop.permute.xlu0 %197 }
  0x95   :  { %v1696_v29 = vpop.permute.xlu1 %202 }
  0x98   :  { %v118_v32 = vpop.permute.xlu0 %117 }
  0x99   :  { %v123_v31 = vpop.permute.xlu1 %122 }
  0x9c   :  { %v1702_v34 = vpop.permute.xlu0 %207 }
  0x9d   :  { %v1700_v33 = vpop.permute.xlu1 %212 }
  0xa0   :  { %v128_v36 = vpop.permute.xlu0 %127 }
  0xa1   :  { %v133_v35 = vpop.permute.xlu1 %132 }
  0xa4   :  { %v1706_v38 = vpop.permute.xlu0 %217 }
  0xa5   :  { %v1704_v37 = vpop.permute.xlu1 %222 }
  0xa8   :  { %v138_v40 = vpop.permute.xlu0 %137 }
  0xa9   :  { %v143_v39 = vpop.permute.xlu1 %142 }
  0xac   :  { %v1710_v42 = vpop.permute.xlu0 %227 }
  0xad   :  { %v1708_v41 = vpop.permute.xlu1 %232 }
  0xb0   :  { %v148_v51 = vpop.permute.xlu0 %147 }
  0xb1   :  { %v153_v48 = vpop.permute.xlu1 %152 }
  0xb4   :  { %v1718_v0 = vpop.permute.xlu0 %237 }
  0xb5   :  { %v1714_v61 = vpop.permute.xlu1 %242 }
  0xb8   :  { %v158_v12 = vpop.permute.xlu0 %157 }
  0xb9   :  { %v163_v9 = vpop.permute.xlu1 %162 }
  0xdb   :  { %v1198_v43 = vpop.f32.mrb[0].mxu0 }
  0xdc   :  { %v424_v44 = vadd.f32 %v1198_v43, %v103_v23  ;;  %v418_v45 = vpop.f32.mrb[1].mxu0  ;;  %v1724_v23 = vpop.permute.xlu1 %252 }
  0xdd   :  { %v419_v46 = vadd.f32 %v418_v45, %v98_v20 }
  0xde   :  { %v578_v47 = vmax.f32 %v424_v44, 0.0 }
  0xdf   :  { %v577_v49 = vmax.f32 %v419_v46, 0.0  ;;  %v1201_v50 = vpop.f32.mrb[2].mxu0 }
  0xe0   :  { %v434_v52 = vadd.f32 %v1201_v50, %v113_v27  ;;  %v428_v53 = vpop.f32.mrb[3].mxu0  ;;  %v173_v46 = vpop.permute.xlu1 %172 }
  0xe1   :  { %v429_v54 = vadd.f32 %v428_v53, %v108_v28  ;;  %v1712_v55 = vpack.c.bf16 %v578_v47, %v577_v49 }
  0xe2   :  { %v580_v56 = vmax.f32 %v434_v52, 0.0 }
  0xe3   :  { %v579_v57 = vmax.f32 %v429_v54, 0.0  ;;  %v1204_v58 = vpop.f32.mrb[4].mxu0 }
  0xe4   :  { %v444_v59 = vadd.f32 %v1204_v58, %v123_v31  ;;  %v438_v60 = vpop.f32.mrb[5].mxu0  ;;  %v1728_v31 = vpop.permute.xlu0 %247 }
  0xe5   :  { %v1716_v62 = vpack.c.bf16 %v580_v56, %v579_v57  ;;  %v439_v63 = vadd.f32 %v438_v60, %v118_v32 }
  0xe6   :  { %v582_v1 = vmax.f32 %v444_v59, 0.0 }
  0xe7   :  { %v581_v2 = vmax.f32 %v439_v63, 0.0  ;;  %v1207_v3 = vpop.f32.mrb[6].mxu0 }
  0xe8   :  { %v454_v4 = vadd.f32 %v1207_v3, %v133_v35  ;;  %v448_v5 = vpop.f32.mrb[7].mxu0  ;;  %v168_v49 = vpop.permute.xlu0 %167 }
  0xe9   :  { %v1720_v6 = vpack.c.bf16 %v582_v1, %v581_v2  ;;  %v449_v7 = vadd.f32 %v448_v5, %v128_v36 }
  0xea   :  { %v584_v8 = vmax.f32 %v454_v4, 0.0 }
  0xeb   :  { %v583_v10 = vmax.f32 %v449_v7, 0.0  ;;  %v1210_v11 = vpop.f32.mrb[8].mxu0 }
  0xec   :  { %v464_v13 = vadd.f32 %v1210_v11, %v143_v39  ;;  %v458_v14 = vpop.f32.mrb[9].mxu0 }
  0xed   :  { %v1722_v15 = vpack.c.bf16 %v584_v8, %v583_v10  ;;  %v459_v16 = vadd.f32 %v458_v14, %v138_v40 }
  0xee   :  { %v586_v17 = vmax.f32 %v464_v13, 0.0 }
  0xef   :  { %v585_v18 = vmax.f32 %v459_v16, 0.0  ;;  %v1213_v19 = vpop.f32.mrb[10].mxu0 }
  0xf0   :  { %v474_v20 = vadd.f32 %v1213_v19, %v153_v48  ;;  %v468_v22 = vpop.f32.mrb[11].mxu0 }
  0xf1   :  { %v1726_v27 = vpack.c.bf16 %v586_v17, %v585_v18  ;;  %v469_v28 = vadd.f32 %v468_v22, %v148_v51 }
  0xf2   :  { %v588_v32 = vmax.f32 %v474_v20, 0.0 }
  0xf3   :  { %v587_v35 = vmax.f32 %v469_v28, 0.0  ;;  %v1216_v36 = vpop.f32.mrb[12].mxu0 }
  0xf4   :  { %v484_v39 = vadd.f32 %v1216_v36, %v163_v9  ;;  %v478_v43 = vpop.f32.mrb[13].mxu0 }
  0xf5   :  { %v1730_v44 = vpack.c.bf16 %v588_v32, %v587_v35  ;;  %v479_v40 = vadd.f32 %v478_v43, %v158_v12 }
  0xf6   :  { %v590_v45 = vmax.f32 %v484_v39, 0.0 }
  0xf7   :  { %v589_v47 = vmax.f32 %v479_v40, 0.0  ;;  %v1219_v48 = vpop.f32.mrb[14].mxu0 }
  0xf8   :  { %v494_v50 = vadd.f32 %v1219_v48, %v173_v46  ;;  %v488_v52 = vpop.f32.mrb[15].mxu0 }
  0xf9   :  { %v1732_v53 = vpack.c.bf16 %v590_v45, %v589_v47  ;;  %v489_v51 = vadd.f32 %v488_v52, %v168_v49 }
  0xfa   :  { %v592_v54 = vmax.f32 %v494_v50, 0.0 }
  0xfb   :  { %v591_v56 = vmax.f32 %v489_v51, 0.0  ;;  %v1222_v57 = vpop.f32.mrb[16].mxu0 }
  0xfc   :  { %v504_v58 = vadd.f32 %v1222_v57, %v1690_v24  ;;  %v498_v59 = vpop.f32.mrb[17].mxu0  ;;  %v1322_v57 = vld [vmem:[%s1831_s3 + $0x44] ss:$8 sps:$4 sm:$0xff]  }
  0xfd   :  { %v1735_v60 = vpack.c.bf16 %v592_v54, %v591_v56  ;;  %v499_v63 = vadd.f32 %v498_v59, %v1685_v21  ;;  %v1319_v54 = vld [vmem:[%s1831_s3 + $0x34] ss:$8 sps:$4 sm:$0xff]   ;;  %v1321_v56 = vld [vmem:[%s1831_s3 + $0x30] ss:$8 sps:$4 sm:$0xff]  }
  0xfe   :  { %v594_v1 = vmax.f32 %v504_v58, 0.0  ;;  %v1324_v58 = vld [vmem:[%s1831_s3 + $0x40] ss:$8 sps:$4 sm:$0xff]   ;;  %v1325_v59 = vld [vmem:[%s1831_s3 + $0x54] ss:$8 sps:$4 sm:$0xff]  }
  0xff   :  { %v593_v2 = vmax.f32 %v499_v63, 0.0  ;;  %v1225_v3 = vpop.f32.mrb[18].mxu0  ;;  %v1328_v63 = vld [vmem:[%s1831_s3 + $0x64] ss:$8 sps:$4 sm:$0xff]  }
 0x100   :  { %v514_v4 = vadd.f32 %v1225_v3, %v1692_v25  ;;  %v508_v5 = vpop.f32.mrb[19].mxu0  ;;  %v1333_v3 = vld [vmem:[%s1831_s3 + $0x70] ss:$8 sps:$4 sm:$0xff]  }
 0x101   :  { %v509_v7 = vadd.f32 %v508_v5, %v1694_v26  ;;  %v633_v8 = vpack.c.bf16 %v594_v1, %v593_v2  ;;  %v1330_v1 = vld [vmem:[%s1831_s3 + $0x60] ss:$8 sps:$4 sm:$0xff]   ;;  %v1331_v2 = vld [vmem:[%s1831_s3 + $0x74] ss:$8 sps:$4 sm:$0xff]   ;;  %v1365_v5 = vmov 0.0  }
 0x102   :  { %v596_v9 = vmax.f32 %v514_v4, 0.0  ;;  %v1363_v4 = vmov 0.0|0.0   ;;  %1276 = vmatprep.mubr.msk.f32.mxu0 %vm1364_vm1, %v1365_v5 }
 0x103   :  { %v595_v10 = vmax.f32 %v509_v7, 0.0  ;;  %v1228_v11 = vpop.f32.mrb[20].mxu0  ;;  %1113 = vmatprep.subr.bf16.mxu1 %v633_v8  ;;  %1279 = vmatprep.subr.bf16.mxu0 %v1363_v4 }
 0x104   :  { %v524_v24 = vadd.f32 %v1228_v11, %v1696_v29  ;;  %v518_v12 = vpop.f32.mrb[21].mxu0  ;;  %1114 = vmatpush3.bf16.msra.mxu1 %v1712_v55  ;;  %v660_v11 = vpop.permute.xlu0 %659 }
 0x105   :  { %v634_v13 = vpack.c.bf16 %v596_v9, %v595_v10  ;;  %v519_v21 = vadd.f32 %v518_v12, %v1698_v30 }
 0x106   :  { %v598_v14 = vmax.f32 %v524_v24, 0.0 }
 0x107   :  { %v597_v16 = vmax.f32 %v519_v21, 0.0  ;;  %v1231_v17 = vpop.f32.mrb[22].mxu0  ;;  %1115 = vmatprep.subr.bf16.mxu1 %v634_v13  ;;  %v665_v21 = vpop.permute.xlu1 %664 }
 0x108   :  { %v534_v25 = vadd.f32 %v1231_v17, %v1700_v33  ;;  %v528_v26 = vpop.f32.mrb[23].mxu0  ;;  %1116 = vmatpush3.bf16.msra.mxu1 %v1716_v62 }
 0x109   :  { %v635_v18 = vpack.c.bf16 %v598_v14, %v597_v16  ;;  %v529_v19 = vadd.f32 %v528_v26, %v1702_v34 }
 0x10a   :  { %v600_v20 = vmax.f32 %v534_v25, 0.0 }
 0x10b   :  { %v599_v29 = vmax.f32 %v529_v19, 0.0  ;;  %v1234_v22 = vpop.f32.mrb[24].mxu0  ;;  %1117 = vmatprep.subr.bf16.mxu1 %v635_v18 }
 0x10c   :  { %v544_v55 = vadd.f32 %v1234_v22, %v1704_v37  ;;  %v538_v28 = vpop.f32.mrb[25].mxu0  ;;  %1118 = vmatpush3.bf16.msra.mxu1 %v1720_v6 }
 0x10d   :  { %v636_v30 = vpack.c.bf16 %v600_v20, %v599_v29  ;;  %v539_v32 = vadd.f32 %v538_v28, %v1706_v38  ;;  %v670_v29 = vpop.permute.xlu0 %669 }
 0x10e   :  { %v602_v35 = vmax.f32 %v544_v55, 0.0 }
 0x10f   :  { %v601_v33 = vmax.f32 %v539_v32, 0.0  ;;  %v1237_v36 = vpop.f32.mrb[26].mxu0  ;;  %1119 = vmatprep.subr.bf16.mxu1 %v636_v30  ;;  %v675_v30 = vpop.permute.xlu1 %674 }
 0x110   :  { %v554_v62 = vadd.f32 %v1237_v36, %v1708_v41  ;;  %v548_v39 = vpop.f32.mrb[27].mxu0  ;;  %1120 = vmatpush3.bf16.msra.mxu1 %v1722_v15 }
 0x111   :  { %v637_v34 = vpack.c.bf16 %v602_v35, %v601_v33  ;;  %v549_v43 = vadd.f32 %v548_v39, %v1710_v42 }
 0x112   :  { %v604_v40 = vmax.f32 %v554_v62, 0.0 }
 0x113   :  { %v603_v37 = vmax.f32 %v549_v43, 0.0  ;;  %v1240_v45 = vpop.f32.mrb[28].mxu0  ;;  %1121 = vmatprep.subr.bf16.mxu1 %v637_v34 }
 0x114   :  { %v564_v6 = vadd.f32 %v1240_v45, %v1714_v61  ;;  %v558_v46 = vpop.f32.mrb[29].mxu0  ;;  %1122 = vmatpush3.bf16.msra.mxu1 %v1726_v27 }
 0x115   :  { %v638_v38 = vpack.c.bf16 %v604_v40, %v603_v37  ;;  %v559_v47 = vadd.f32 %v558_v46, %v1718_v0  ;;  %v1310_v0 = vld [vmem:[%s1831_s3] ss:$8 sps:$4 sm:$0xff]   ;;  %v680_v40 = vpop.permute.xlu0 %679  ;;  %v685_v46 = vpop.permute.xlu1 %684 }
 0x116   :  { %v606_v48 = vmax.f32 %v564_v6, 0.0 }
 0x117   :  { %v605_v41 = vmax.f32 %v559_v47, 0.0  ;;  %v1243_v49 = vpop.f32.mrb[30].mxu0  ;;  %1123 = vmatprep.subr.bf16.mxu1 %v638_v38 }
 0x118   :  { %v574_v15 = vadd.f32 %v1243_v49, %v1724_v23  ;;  %v568_v50 = vpop.f32.mrb[31].mxu0  ;;  %1124 = vmatpush3.bf16.msra.mxu1 %v1730_v44  ;;  %v1313_v23 = vld [vmem:[%s1831_s3 + $0x14] ss:$8 sps:$4 sm:$0xff]   ;;  %v1316_v44 = vld [vmem:[%s1831_s3 + $0x24] ss:$8 sps:$4 sm:$0xff]  }
 0x119   :  { %v639_v42 = vpack.c.bf16 %v606_v48, %v605_v41  ;;  %v569_v52 = vadd.f32 %v568_v50, %v1728_v31  ;;  %v1315_v31 = vld [vmem:[%s1831_s3 + $0x10] ss:$8 sps:$4 sm:$0xff]  }
 0x11a   :  { %v608_v51 = vmax.f32 %v574_v15, 0.0 }
 0x11b   :  { %v607_v61 = vmax.f32 %v569_v52, 0.0  ;;  %1125 = vmatprep.subr.bf16.mxu1 %v639_v42  ;;  %v690_v52 = vpop.permute.xlu0 %689 }
 0x11c   :  { %1126 = vmatpush3.bf16.msra.mxu1 %v1732_v53  ;;  %v1318_v53 = vld [vmem:[%s1831_s3 + $0x20] ss:$8 sps:$4 sm:$0xff]  }
 0x11d   :  { %v640_v27 = vpack.c.bf16 %v608_v51, %v607_v61 }
 0x11f   :  { %1127 = vmatprep.subr.bf16.mxu1 %v640_v27 }
 0x120   :  { %1128 = vmatpush3.bf16.msra.mxu1 %v1735_v60  ;;  %v1327_v60 = vld [vmem:[%s1831_s3 + $0x50] ss:$8 sps:$4 sm:$0xff]  }
 0x123   :  { %850 = vmatmul.mubr.bf16.vlgmr.msra.gmra.mrb[0].mxu1 %v1310_v0  ;;  %v695_v0 = vpop.permute.xlu1 %694 }
 0x124   :  { %857 = vmatprep.mubr.bf16.mxu1 %v1313_v23 }
 0x12b   :  { %858 = vmatmul.mubr.bf16.gmra.mrb[4].mxu1 %v1315_v31 }
 0x12c   :  { %865 = vmatprep.mubr.bf16.mxu1 %v1316_v44 }
 0x133   :  { %866 = vmatmul.mubr.bf16.gmra.mrb[8].mxu1 %v1318_v53 }
 0x134   :  { %873 = vmatprep.mubr.bf16.mxu1 %v1319_v54 }
 0x13b   :  { %874 = vmatmul.mubr.bf16.gmra.mrb[12].mxu1 %v1321_v56 }
 0x13c   :  { %881 = vmatprep.mubr.bf16.mxu1 %v1322_v57 }
 0x143   :  { %882 = vmatmul.mubr.bf16.gmra.mrb[16].mxu1 %v1324_v58 }
 0x144   :  { %889 = vmatprep.mubr.bf16.mxu1 %v1325_v59  ;;  %v700_v59 = vpop.permute.xlu0 %699 }
 0x14b   :  { %890 = vmatmul.mubr.bf16.gmra.mrb[20].mxu1 %v1327_v60 }
 0x14c   :  { %897 = vmatprep.mubr.bf16.mxu1 %v1328_v63 }
 0x153   :  { %898 = vmatmul.mubr.bf16.gmra.mrb[24].mxu1 %v1330_v1 }
 0x154   :  { %905 = vmatprep.mubr.bf16.mxu1 %v1331_v2  ;;  %v705_v2 = vpop.permute.xlu1 %704 }
 0x15b   :  { %906 = vmatmul.mubr.bf16.gmra.mrb[28].mxu1 %v1333_v3 }
 0x1f6   :  { %v1129_v7 = vpop.f32.mrb[0].mxu1 }
 0x1f7   :  { %v1130_v8 = vpop.f32.mrb[1].mxu1 }
 0x1f8   :  { %v1131_v9 = vadd.f32 %v1130_v8, %v1129_v7  ;;  %v1132_v10 = vpop.f32.mrb[2].mxu1 }
 0x1f9   :  { %v1133_v24 = vpop.f32.mrb[3].mxu1 }
 0x1fa   :  { %v852_v12 = vadd.f32 %v1131_v9, %v660_v11  ;;  %v1134_v13 = vadd.f32 %v1133_v24, %v1132_v10 }
 0x1fc   :  { %v855_v14 = vadd.f32 %v1134_v13, %v665_v21  ;;  %v914_v16 = vmax.f32 %v852_v12, 0.0  ;;  %v710_v12 = vpop.permute.xlu0 %709 }
 0x1fe   :  { %v915_v17 = vmax.f32 %v855_v14, 0.0  ;;  %v1135_v25 = vpop.f32.mrb[4].mxu1 }
 0x1ff   :  { %v1136_v26 = vpop.f32.mrb[5].mxu1 }
 0x200   :  { %v1280_v18 = vpack.c.bf16 %v915_v17, %v914_v16  ;;  %v1137_v19 = vadd.f32 %v1136_v26, %v1135_v25  ;;  %v1138_v20 = vpop.f32.mrb[6].mxu1  ;;  %v715_v16 = vpop.permute.xlu1 %714 }
 0x201   :  { %v1139_v22 = vpop.f32.mrb[7].mxu1 }
 0x202   :  { %v860_v55 = vadd.f32 %v1137_v19, %v670_v29  ;;  %v1140_v28 = vadd.f32 %v1139_v22, %v1138_v20  ;;  %1281 = vmatpush3.bf16.msra.mxu0 %v1280_v18 }
 0x203   :  { %1282 = vmatprep.subr.bf16.mxu0 %v1363_v4 }
 0x204   :  { %v863_v32 = vadd.f32 %v1140_v28, %v675_v30  ;;  %v916_v35 = vmax.f32 %v860_v55, 0.0  ;;  %v720_v55 = vpop.permute.xlu0 %719 }
 0x206   :  { %v917_v33 = vmax.f32 %v863_v32, 0.0  ;;  %v1141_v36 = vpop.f32.mrb[8].mxu1 }
 0x207   :  { %v1142_v62 = vpop.f32.mrb[9].mxu1 }
 0x208   :  { %v1283_v39 = vpack.c.bf16 %v917_v33, %v916_v35  ;;  %v1143_v34 = vadd.f32 %v1142_v62, %v1141_v36  ;;  %v1144_v43 = vpop.f32.mrb[10].mxu1  ;;  %v725_v35 = vpop.permute.xlu1 %724 }
 0x209   :  { %v1145_v37 = vpop.f32.mrb[11].mxu1 }
 0x20a   :  { %v868_v45 = vadd.f32 %v1143_v34, %v680_v40  ;;  %v1146_v6 = vadd.f32 %v1145_v37, %v1144_v43  ;;  %1284 = vmatpush3.bf16.msra.mxu0 %v1283_v39 }
 0x20b   :  { %1285 = vmatprep.subr.bf16.mxu0 %v1363_v4 }
 0x20c   :  { %v871_v38 = vadd.f32 %v1146_v6, %v685_v46  ;;  %v918_v47 = vmax.f32 %v868_v45, 0.0  ;;  %v730_v45 = vpop.permute.xlu0 %729 }
 0x20e   :  { %v919_v48 = vmax.f32 %v871_v38, 0.0  ;;  %v1147_v41 = vpop.f32.mrb[12].mxu1 }
 0x20f   :  { %v1148_v49 = vpop.f32.mrb[13].mxu1 }
 0x210   :  { %v1286_v15 = vpack.c.bf16 %v919_v48, %v918_v47  ;;  %v1149_v50 = vadd.f32 %v1148_v49, %v1147_v41  ;;  %v1150_v42 = vpop.f32.mrb[14].mxu1  ;;  %v735_v47 = vpop.permute.xlu1 %734 }
 0x211   :  { %v1151_v51 = vpop.f32.mrb[15].mxu1 }
 0x212   :  { %v876_v61 = vadd.f32 %v1149_v50, %v690_v52  ;;  %v1152_v27 = vadd.f32 %v1151_v51, %v1150_v42  ;;  %1287 = vmatpush3.bf16.msra.mxu0 %v1286_v15  ;;  %v930_v50 = vld [vmem:[%s1833_s5] sm:$0x1]  ;;  %v937_v42 = vlaneseq  ;;  %s1338_s5 = scalar_lea.vmem %s1025_s14, 16 }
 0x213   :  { %1288 = vmatprep.subr.bf16.mxu0 %v1363_v4  ;;  %p1339_p0 = scmp.ne.s32.totalorder %s1025_s14, %s1338_s5  ;;  %p1344_p2 = scmp.lt.s32.totalorder %s1342_s15, %s1338_s5 }
 0x214   :  { %v879_v23 = vadd.f32 %v1152_v27, %v695_v0  ;;  %v920_v31 = vmax.f32 %v876_v61, 0.0  ;;  %v938_v52 = vshrl.u32 %v937_v42, 7  ;;  %v935_v61 = vpop.permute.xlu0 %934 }
 0x215   :  { %p1345_p3 = por %p1344_p2, %p1343_p1 }
 0x216   :  { %v921_v44 = vmax.f32 %v879_v23, 0.0  ;;  %v1153_v53 = vpop.f32.mrb[16].mxu1  ;;  %v939_v51 = vsub.s32 0, %v938_v52 }
 0x217   :  { %v1154_v54 = vpop.f32.mrb[17].mxu1  ;;  %p1346_p4 = pnand %p1345_p3, %p1339_p0 }
 0x218   :  { %v1289_v56 = vpack.c.bf16 %v921_v44, %v920_v31  ;;  %v1155_v57 = vadd.f32 %v1154_v54, %v1153_v53  ;;  %v1156_v58 = vpop.f32.mrb[18].mxu1  ;;  %v940_v27 = vrot.slane %v935_v61, %v939_v51 }
 0x219   :  { %v1157_v60 = vpop.f32.mrb[19].mxu1 }
 0x21a   :  { %v884_v63 = vadd.f32 %v1155_v57, %v700_v59  ;;  %v1158_v1 = vadd.f32 %v1157_v60, %v1156_v58  ;;  %1290 = vmatpush3.bf16.msra.mxu0 %v1289_v56 }
 0x21b   :  { %1291 = vmatprep.subr.bf16.mxu0 %v1363_v4 }
 0x21c   :  { %v887_v3 = vadd.f32 %v1158_v1, %v705_v2  ;;  %v922_v5 = vmax.f32 %v884_v63, 0.0 }
 0x21e   :  { %v923_v7 = vmax.f32 %v887_v3, 0.0  ;;  %v1159_v8 = vpop.f32.mrb[20].mxu1 }
 0x21f   :  { %v1160_v9 = vpop.f32.mrb[21].mxu1 }
 0x220   :  { %v1292_v10 = vpack.c.bf16 %v923_v7, %v922_v5  ;;  %v1161_v11 = vadd.f32 %v1160_v9, %v1159_v8  ;;  %v1162_v24 = vpop.f32.mrb[22].mxu1 }
 0x221   :  { %v1163_v13 = vpop.f32.mrb[23].mxu1 }
 0x222   :  { %v892_v21 = vadd.f32 %v1161_v11, %v710_v12  ;;  %v1164_v14 = vadd.f32 %v1163_v13, %v1162_v24  ;;  %1293 = vmatpush3.bf16.msra.mxu0 %v1292_v10 }
 0x223   :  { %1294 = vmatprep.subr.bf16.mxu0 %v1363_v4 }
 0x224   :  { %v895_v17 = vadd.f32 %v1164_v14, %v715_v16  ;;  %v924_v25 = vmax.f32 %v892_v21, 0.0 }
 0x226   :  { %v925_v26 = vmax.f32 %v895_v17, 0.0  ;;  %v1165_v18 = vpop.f32.mrb[24].mxu1 }
 0x227   :  { %v1166_v19 = vpop.f32.mrb[25].mxu1 }
 0x228   :  { %v1295_v20 = vpack.c.bf16 %v925_v26, %v924_v25  ;;  %v1167_v29 = vadd.f32 %v1166_v19, %v1165_v18  ;;  %v1168_v22 = vpop.f32.mrb[26].mxu1 }
 0x229   :  { %v1169_v28 = vpop.f32.mrb[27].mxu1 }
 0x22a   :  { %v900_v30 = vadd.f32 %v1167_v29, %v720_v55  ;;  %v1170_v32 = vadd.f32 %v1169_v28, %v1168_v22  ;;  %1296 = vmatpush3.bf16.msra.mxu0 %v1295_v20 }
 0x22b   :  { %1297 = vmatprep.subr.bf16.mxu0 %v1363_v4 }
 0x22c   :  { %v903_v33 = vadd.f32 %v1170_v32, %v725_v35  ;;  %v926_v36 = vmax.f32 %v900_v30, 0.0 }
 0x22e   :  { %v927_v62 = vmax.f32 %v903_v33, 0.0  ;;  %v1171_v39 = vpop.f32.mrb[28].mxu1 }
 0x22f   :  { %v1172_v34 = vpop.f32.mrb[29].mxu1 }
 0x230   :  { %v1298_v43 = vpack.c.bf16 %v927_v62, %v926_v36  ;;  %v1173_v40 = vadd.f32 %v1172_v34, %v1171_v39  ;;  %v1174_v37 = vpop.f32.mrb[30].mxu1 }
 0x231   :  { %v1175_v6 = vpop.f32.mrb[31].mxu1 }
 0x232   :  { %v908_v46 = vadd.f32 %v1173_v40, %v730_v45  ;;  %v1176_v38 = vadd.f32 %v1175_v6, %v1174_v37  ;;  %1299 = vmatpush3.bf16.msra.mxu0 %v1298_v43 }
 0x233   :  { %1300 = vmatprep.subr.bf16.mxu0 %v1363_v4 }
 0x234   :  { %v911_v48 = vadd.f32 %v1176_v38, %v735_v47  ;;  %v928_v41 = vmax.f32 %v908_v46, 0.0 }
 0x236   :  { %v929_v49 = vmax.f32 %v911_v48, 0.0 }
 0x238   :  { %v1301_v15 = vpack.c.bf16 %v929_v49, %v928_v41 }
 0x23a   :  { %1302 = vmatpush3.bf16.msra.mxu0 %v1301_v15 }
 0x23d   :  { %1277 = vmatmul.mubr.f32.vlgmr.msra.gmra.mrb[32].mxu0 %v930_v50 }
 0x310   :  { %v1007_v0 = vpop.f32.mrb[32].mxu0 }
 0x311   :  { %v1008_v23 = vadd.f32 %v1007_v0, %v940_v27  ;;  %v1278_v31 = vpop.f32.mrb[33].mxu0 }
 0x313   :  { %v1011_v44 = vsub.f32 0.0, %v1008_v23 }
 0x315   :  { %v1012_v4 = vmul.f32 1.442695, %v1011_v44 }
 0x317   :  { %1334 = vpow2.f32 %v1012_v4 }
 0x321   :  { %v1335_v53 = vpop.eup %1334 }
 0x322   :  { %v1014_v54 = vadd.f32 1.0, %v1335_v53 }
 0x324   :  { %1336 = vrcp.f32 %v1014_v54 }
 0x32e   :  { %v1337_v56 = vpop.eup %1336 }
 0x32f   :  { %1017 = vst.msk [vmem:[#allocation3] sm:$0x1] %vm1016_vm2, %v1337_v56 }
 0x330   :  { %1349 = shalt.err (!%p1346_p4)
}
 0x331   :  { %s1350_s18 = scalar_lea.hbm %s1835_s7, 16 }
 0x332   :  { %p1351_p5 = scmp.ne.s32.totalorder %s1835_s7, %s1350_s18  ;;  %p1354_p6 = scmp.lt.u32.totalorder %s1350_s18, %s1835_s7 }
 0x334   :  { %p1356_p7 = pnand %p1354_p6, %p1351_p5 }
 0x336   :  { %1359 = shalt.err (!%p1356_p7)
}
 0x337   :  { %1027 = dma.vmem_to_hbm [thread:$0]  %s1025_s14, 16, %s1835_s7, [#allocation4]  }
 0x338   :  { %1360 = dma.done.wait [#allocation4], 16  }
 0x339   :  { %1361 = vsyncadd [#allocation4], 4294967280 }
 0x33a   :  { %1031 = vsyncpa [#allocation4], 1 }

</bundles_post_ra>
